<compile_context>
chip_gen: v7x
topology: tpu7x:2x2x1
jax: 0.10.0
libtpu: 0.0.40
codegen_flags: <defaults>
</compile_context>

<pallas_src>
import functools
import math

import jax
import jax.numpy as jnp
from jax.experimental import pallas as pl
from jax.experimental.pallas import tpu as pltpu


# ----------------------------------------------------------------------------
# Helpers
# ----------------------------------------------------------------------------
def _round_up(x, m):
    return ((x + m - 1) // m) * m


def _choose_m_tile(m):
    """Lane tile (multiple of 128). Prefers >=2 grid steps (v7x has 2 TCs)."""
    for tm in (512, 256, 128):
        if m > tm:
            return tm
    return 128


# ----------------------------------------------------------------------------
# Pallas kernels
# ----------------------------------------------------------------------------
def _gemm_bias_act_kernel(w_ref, a_ref, b_ref, o_ref, *, act):
    """o = act(w @ a + b).  w:(OCp,K) bf16, a:(K,TM) bf16, b:(OCp,1) f32.

    Output lanes = TM (big, multiple of 128) -> unmasked lane-dense stores.
    f32 MXU accumulation; bias/activation in f32; store in o_ref.dtype.
    """
    y = jnp.dot(w_ref[...], a_ref[...], preferred_element_type=jnp.float32)
    y = y + b_ref[...]
    if act == "relu":
        y = jnp.maximum(y, 0.0)
    elif act == "sigmoid":
        y = pl.reciprocal(1.0 + jnp.exp(-y), approx=True)
    o_ref[...] = y.astype(o_ref.dtype)


def gemm_bias_act_t(w_bf16, a_t, b_f32, act="none", out_dtype=jnp.bfloat16):
    """act(w_bf16 @ a_t + b[:,None]) with M = a_t.shape[1] in lanes.

    w_bf16: (OCp, K) bf16 (pre-padded/pre-cast at init)
    a_t:    (K, M)  any dtype (cast to bf16 here; fusable into the input DMA)
    b_f32:  (OCp,)  f32
    Returns (OCp, M) in out_dtype.
    """
    OCp, K = w_bf16.shape
    K2, M = a_t.shape
    assert K == K2
    a_t = a_t.astype(jnp.bfloat16)
    tm = _choose_m_tile(M)
    Mp = _round_up(M, tm)
    if Mp != M:
        a_t = jnp.pad(a_t, ((0, 0), (0, Mp - M)))
    grid = (Mp // tm,)
    out = pl.pallas_call(
        functools.partial(_gemm_bias_act_kernel, act=act),
        out_shape=jax.ShapeDtypeStruct((OCp, Mp), out_dtype),
        grid=grid,
        in_specs=[
            pl.BlockSpec((OCp, K), lambda i: (0, 0)),   # weights: resident
            pl.BlockSpec((K, tm), lambda i: (0, i)),    # activations: tiled over M
            pl.BlockSpec((OCp, 1), lambda i: (0, 0)),   # bias: resident
        ],
        out_specs=pl.BlockSpec((OCp, tm), lambda i: (0, i)),
        compiler_params=pltpu.CompilerParams(
            dimension_semantics=("parallel",),
            vmem_limit_bytes=32 * 1024 * 1024,
            # Let XLA fuse the im2col tap-stack / pad / reshape producer into
            # the activation operand instead of materializing it in HBM.
            allow_input_fusion=[False, True, False],
        ),
    )(w_bf16, a_t, b_f32.reshape(OCp, 1))
    return out[:, :M] if Mp != M else out


def _latent_head_kernel(x_ref, wcat_ref, bcat_ref, eps_ref, wdec_ref, bdec_ref,
                        mulv_ref, d_ref, *, latent_dim):
    """Fused fc_mu+fc_var (one concatenated MXU pass), reparameterization and
    decoder_input linear.  mu/log_var written as a single (N, 2L) output."""
    L = latent_dim
    ml = jnp.dot(x_ref[...], wcat_ref[...],
                 preferred_element_type=jnp.float32) + bcat_ref[...]
    mu = ml[:, :L]
    log_var = ml[:, L:]
    z = mu + eps_ref[...] * jnp.exp(0.5 * log_var)
    d = jnp.dot(z.astype(jnp.bfloat16), wdec_ref[...],
                preferred_element_type=jnp.float32) + bdec_ref[...]
    mulv_ref[...] = ml
    d_ref[...] = d.astype(d_ref.dtype)


def latent_head(x_flat, w_cat, b_cat, eps, w_dec, b_dec, latent_dim):
    """x_flat:(N,F) bf16 -> (mulv (N,2L) f32, decoder_input (N,F2) bf16)."""
    N, F = x_flat.shape
    L = latent_dim
    F2 = w_dec.shape[1]
    # TODO(synk): for very large F this loads w_cat/w_dec as single blocks;
    # add an F-reduction grid axis + f32 accumulator for v7x's 64 MiB VMEM.
    return pl.pallas_call(
        functools.partial(_latent_head_kernel, latent_dim=L),
        out_shape=(jax.ShapeDtypeStruct((N, 2 * L), jnp.float32),
                   jax.ShapeDtypeStruct((N, F2), jnp.bfloat16)),
        grid=(1,),
        in_specs=[
            pl.BlockSpec((N, F), lambda i: (0, 0)),
            pl.BlockSpec((F, 2 * L), lambda i: (0, 0)),
            pl.BlockSpec((1, 2 * L), lambda i: (0, 0)),
            pl.BlockSpec((N, L), lambda i: (0, 0)),
            pl.BlockSpec((L, F2), lambda i: (0, 0)),
            pl.BlockSpec((1, F2), lambda i: (0, 0)),
        ],
        out_specs=(pl.BlockSpec((N, 2 * L), lambda i: (0, 0)),
                   pl.BlockSpec((N, F2), lambda i: (0, 0))),
    )(x_flat, w_cat, b_cat.reshape(1, 2 * L), eps, w_dec, b_dec.reshape(1, F2))


# ----------------------------------------------------------------------------
# Conv / ConvTranspose glue (CNHW internal layout; GEMMs in Pallas)
# ----------------------------------------------------------------------------
def im2col_cnhw(x, kh, kw, stride, padding):
    """x:(C,N,H,W) -> col:(C*kh*kw, N*OH*OW) in x.dtype; K ordered (C,kh,kw).

    Built in bf16; flagged for input fusion into the GEMM's activation DMA.
    """
    C, N, H, W = x.shape
    xp = jnp.pad(x, ((0, 0), (0, 0), (padding, padding), (padding, padding)))
    OH = (H - kh + 2 * padding) // stride + 1
    OW = (W - kw + 2 * padding) // stride + 1
    taps = []
    for i in range(kh):
        for j in range(kw):
            taps.append(xp[:, :, i:i + stride * OH:stride, j:j + stride * OW:stride])
    col = jnp.stack(taps, axis=1).reshape(C * kh * kw, N * OH * OW)
    return col, OH, OW


def conv2d_cnhw(x, wmat_bf16, b_pad, oc, kh, kw, stride, padding, act):
    """PyTorch Conv2d on CNHW activations.  x:(Cin,N,H,W) bf16 -> (oc,N,OH,OW) bf16."""
    Cin, N, H, W = x.shape
    col, OH, OW = im2col_cnhw(x, kh, kw, stride, padding)
    y = gemm_bias_act_t(wmat_bf16, col, b_pad, act=act, out_dtype=jnp.bfloat16)
    return y[:oc].reshape(oc, N, OH, OW)


def conv_transpose2d_cnhw(x, wmat_bf16, rows, b, cout, kh, kw, stride, padding,
                          act, out_dtype):
    """PyTorch ConvTranspose2d on CNHW activations.

    x:(Cin,N,H,W) bf16, wmat_bf16:(rows_pad, Cin) pre-built at init,
    rows = cout*kh*kw.  One dense GEMM (no dilation zeros) -> phase-grouped
    sub-pixel reconstruction (stride^2 smaller accumulators) -> one
    depth-to-space interleave + crop + bias + activation.
    """
    Cin, N, H, W = x.shape
    M = N * H * W
    s = stride
    zero_b = jnp.zeros((wmat_bf16.shape[0],), jnp.float32)
    z = gemm_bias_act_t(wmat_bf16, x.reshape(Cin, M), zero_b,
                        act="none", out_dtype=jnp.bfloat16)
    z = z[:rows].reshape(cout, kh, kw, N, H, W)

    Hf = (H - 1) * s + kh
    Wf = (W - 1) * s + kw
    Hq = -(-Hf // s)
    Wq = -(-Wf // s)

    # Phase-grouped accumulation: tap (i, j) contributes to output phase
    # (i % s, j % s) at phase-index offset (i // s, j // s).
    phase_rows = []
    for pa in range(s):
        phase_cols = []
        for pb in range(s):
            acc = jnp.zeros((cout, N, Hq, Wq), jnp.float32)
            for i in range(pa, kh, s):
                ii = (i - pa) // s
                for j in range(pb, kw, s):
                    jj = (j - pb) // s
                    acc = acc.at[:, :, ii:ii + H, jj:jj + W].add(
                        z[:, i, j].astype(jnp.float32))
            phase_cols.append(acc)
        phase_rows.append(jnp.stack(phase_cols, axis=0))
    yph = jnp.stack(phase_rows, axis=0)                 # (s, s, cout, N, Hq, Wq)

    # Depth-to-space interleave of the phases, then crop / bias / activation.
    y_full = jnp.transpose(yph, (2, 3, 4, 0, 5, 1)).reshape(cout, N, Hq * s, Wq * s)
    OH = (H - 1) * s - 2 * padding + kh
    OW = (W - 1) * s - 2 * padding + kw
    y = y_full[:, :, padding:padding + OH, padding:padding + OW]
    y = y + b.reshape(cout, 1, 1, 1)
    if act == "relu":
        y = jnp.maximum(y, 0.0)
    else:
        # PyTorch's create_decoder_block maps any non-'relu' activation to Sigmoid.
        y = jax.nn.sigmoid(y)
    return y.astype(out_dtype)


# ----------------------------------------------------------------------------
# VAE: init (arrays-only params + static config) and forward
# ----------------------------------------------------------------------------
def _uniform(key, shape, fan_in):
    k = 1.0 / math.sqrt(fan_in)
    return jax.random.uniform(key, shape, jnp.float32, -k, k)


def init_vae(key, img_size, latent_dim, encoder_params, decoder_params):
    """Returns (params, config). params is a pure-array pytree (jit-safe);
    config holds all static hyper-parameters."""
    params = {"enc": [], "dec": []}
    config = {"latent_dim": latent_dim, "enc": [], "dec": []}
    keys = iter(jax.random.split(key, 64))

    size = img_size
    for bp in encoder_params:
        cin, cout, k = bp["in_channels"], bp["out_channels"], bp["kernel_size"]
        s, p = bp.get("stride", 1), bp.get("padding", 0)
        fan = cin * k * k
        w = _uniform(next(keys), (cout, cin, k, k), fan)
        b = _uniform(next(keys), (cout,), fan)
        ocp = _round_up(cout, 8)                       # sublane-dense stores
        wmat = jnp.zeros((ocp, cin * k * k), jnp.float32).at[:cout].set(
            w.reshape(cout, -1))
        bpad = jnp.zeros((ocp,), jnp.float32).at[:cout].set(b)
        params["enc"].append({"w": wmat.astype(jnp.bfloat16), "b": bpad})
        config["enc"].append({"oc": cout, "k": k, "s": s, "p": p})
        size = (size - k + 2 * p) // s + 1

    final_hid = encoder_params[-1]["out_channels"]
    flat = size * size * final_hid
    config["encoded_img_size"] = size
    config["final_hid"] = final_hid

    w_mu = _uniform(next(keys), (flat, latent_dim), flat)
    b_mu = _uniform(next(keys), (latent_dim,), flat)
    w_var = _uniform(next(keys), (flat, latent_dim), flat)
    b_var = _uniform(next(keys), (latent_dim,), flat)
    params["w_cat"] = jnp.concatenate([w_mu, w_var], 1).astype(jnp.bfloat16)
    params["b_cat"] = jnp.concatenate([b_mu, b_var], 0)                 # (2L,) f32
    params["dec_in_w"] = _uniform(next(keys), (latent_dim, flat),
                                  latent_dim).astype(jnp.bfloat16)
    params["dec_in_b"] = _uniform(next(keys), (flat,), latent_dim)      # f32

    for bp in decoder_params:
        cin, cout, k = bp["in_channels"], bp["out_channels"], bp["kernel_size"]
        s, p = bp.get("stride", 1), bp.get("padding", 0)
        fan = cout * k * k                              # PyTorch ConvT fan_in
        w_t = _uniform(next(keys), (cin, cout, k, k), fan)
        b = _uniform(next(keys), (cout,), fan)
        rows = cout * k * k
        rp = _round_up(rows, 8)
        wmat = jnp.transpose(w_t, (1, 2, 3, 0)).reshape(rows, cin)      # pre-transposed once
        wmat = jnp.zeros((rp, cin), jnp.float32).at[:rows].set(wmat)
        params["dec"].append({"w": wmat.astype(jnp.bfloat16), "b": b})
        config["dec"].append({"cout": cout, "rows": rows, "k": k, "s": s, "p": p,
                              "act": bp.get("activation", "relu")})
    return params, config


def make_vae_forward(config):
    """Builds the forward fn with all static config closed over (jit-safe)."""
    enc_cfg = tuple(config["enc"])
    dec_cfg = tuple(config["dec"])
    latent_dim = config["latent_dim"]
    final_hid = config["final_hid"]
    enc_size = config["encoded_img_size"]
    n_dec = len(dec_cfg)

    def forward(params, x, eps):
        # ---- encoder (Conv2d + ReLU), internal layout CNHW, bf16 path ----
        h = jnp.transpose(x, (1, 0, 2, 3)).astype(jnp.bfloat16)        # (C,N,H,W)
        for blk, c in zip(params["enc"], enc_cfg):
            h = conv2d_cnhw(h, blk["w"], blk["b"], c["oc"], c["k"], c["k"],
                            c["s"], c["p"], act="relu")
        C, Nb, hh, ww = h.shape
        # PyTorch flatten order (C, h, w) per sample.
        h_flat = jnp.transpose(h, (1, 0, 2, 3)).reshape(Nb, C * hh * ww)

        # ---- fused fc_mu/fc_var + reparameterize + decoder_input ----
        mulv, d = latent_head(h_flat, params["w_cat"], params["b_cat"], eps,
                              params["dec_in_w"], params["dec_in_b"], latent_dim)
        mu = mulv[:, :latent_dim]
        log_var = mulv[:, latent_dim:]

        d = d.reshape(Nb, final_hid, enc_size, enc_size)
        d = jnp.transpose(d, (1, 0, 2, 3))                             # CNHW, bf16

        # ---- decoder (ConvTranspose2d + act) ----
        for idx, (blk, c) in enumerate(zip(params["dec"], dec_cfg)):
            out_dtype = jnp.float32 if idx == n_dec - 1 else jnp.bfloat16
            d = conv_transpose2d_cnhw(d, blk["w"], c["rows"], blk["b"], c["cout"],
                                      c["k"], c["k"], c["s"], c["p"], c["act"],
                                      out_dtype)

        xhat = jnp.transpose(d, (1, 0, 2, 3))                          # back to NCHW
        if xhat.ndim == 3:
            xhat = xhat[:, None]
        return xhat, x, mu, log_var

    return forward


# ----------------------------------------------------------------------------
# Demo
# ----------------------------------------------------------------------------
if __name__ == "__main__":
    IMG_SIZE = 16
    LATENT_DIM = 32
    encoder_params = [
        dict(in_channels=4, out_channels=8, kernel_size=3, stride=2, padding=1),
        dict(in_channels=8, out_channels=16, kernel_size=3, stride=2, padding=1),
    ]
    decoder_params = [
        dict(in_channels=16, out_channels=8, kernel_size=4, stride=2, padding=1,
             activation="relu"),
        dict(in_channels=8, out_channels=4, kernel_size=4, stride=2, padding=1,
             activation="sigmoid"),
    ]

    root = jax.random.PRNGKey(0)
    k_param, k_x, k_eps = jax.random.split(root, 3)

    params, config = init_vae(k_param, IMG_SIZE, LATENT_DIM,
                              encoder_params, decoder_params)

    x = jax.random.normal(k_x, (2, 4, IMG_SIZE, IMG_SIZE), jnp.float32)
    eps = jax.random.normal(k_eps, (2, LATENT_DIM), jnp.float32)

    vae_forward = jax.jit(make_vae_forward(config))
    xhat, x_out, mu, log_var = vae_forward(params, x, eps)
    jax.block_until_ready((xhat, x_out, mu, log_var))

    assert xhat.shape == x.shape, (xhat.shape, x.shape)
    assert xhat.dtype == jnp.float32
    assert mu.shape == (2, LATENT_DIM) and log_var.shape == (2, LATENT_DIM)
    assert bool(jnp.all(jnp.isfinite(xhat)))
    assert bool(jnp.all(jnp.isfinite(mu))) and bool(jnp.all(jnp.isfinite(log_var)))
    print("KERNEL_OK")
</pallas_src>

<mosaic_0001>
module attributes {stable_mosaic.version = 11 : i64} {
  func.func @_gemm_bias_act_kernel(%arg0: i32, %arg1: memref<8x36xbf16, #tpu.memory_space<vmem>>, %arg2: memref<36x128xbf16, #tpu.memory_space<vmem>>, %arg3: memref<8x1xf32, #tpu.memory_space<vmem>>, %arg4: memref<8x128xbf16, #tpu.memory_space<vmem>>) attributes {dimension_semantics = [#tpu.dimension_semantics<parallel>], iteration_bounds = array<i64: 1>, scalar_prefetch = 0 : i64, scratch_operands = 0 : i64, tpu.core_type = #tpu.core_type<tc>, window_params = [{pipeline_mode = #tpu.pipeline_mode<synchronous>, transform_indices = @transform_0, window_bounds = array<i64: 8, 36>}, {transform_indices = @transform_1, window_bounds = array<i64: 36, 128>}, {pipeline_mode = #tpu.pipeline_mode<synchronous>, transform_indices = @transform_2, window_bounds = array<i64: 8, 1>}, {transform_indices = @transform_3, window_bounds = array<i64: 8, 128>}]} {
    %c0 = arith.constant 0 : index
    %c0_0 = arith.constant 0 : index
    %0 = vector.load %arg1[%c0, %c0_0] : memref<8x36xbf16, #tpu.memory_space<vmem>>, vector<8x36xbf16>
    %c0_1 = arith.constant 0 : index
    %c0_2 = arith.constant 0 : index
    %1 = vector.load %arg2[%c0_1, %c0_2] : memref<36x128xbf16, #tpu.memory_space<vmem>>, vector<36x128xbf16>
    %cst = arith.constant dense<0.000000e+00> : vector<8x128xf32>
    %2 = tpu.matmul %0, %1, %cst {dimension_numbers = #tpu.dot_dimension_numbers<[1], [0], [0], [1], [0, 0, 1, 1], [], []>} : vector<8x36xbf16>, vector<36x128xbf16>, vector<8x128xf32> -> vector<8x128xf32>
    %c0_3 = arith.constant 0 : index
    %c0_4 = arith.constant 0 : index
    %3 = vector.load %arg3[%c0_3, %c0_4] : memref<8x1xf32, #tpu.memory_space<vmem>>, vector<8x1xf32>
    %4 = vector.broadcast %3 : vector<8x1xf32> to vector<8x128xf32>
    %5 = arith.addf %2, %4 : vector<8x128xf32>
    %cst_5 = arith.constant 0.000000e+00 : f32
    %6 = vector.broadcast %cst_5 : f32 to vector<8x128xf32>
    %7 = arith.maximumf %5, %6 : vector<8x128xf32>
    %8 = arith.truncf %7 : vector<8x128xf32> to vector<8x128xbf16>
    %c0_6 = arith.constant 0 : index
    %c0_7 = arith.constant 0 : index
    %9 = vector.load %arg4[%c0_6, %c0_7] : memref<8x128xbf16, #tpu.memory_space<vmem>>, vector<8x128xbf16>
    tpu.vector_store %arg4[%c0_6, %c0_7], %8 {strides = array<i32>} : memref<8x128xbf16, #tpu.memory_space<vmem>>, vector<8x128xbf16>,
    return
  }
  func.func @transform_0(%arg0: i32) -> (i32, i32) {
    %c0_i32 = arith.constant 0 : i32
    %c0_i32_0 = arith.constant 0 : i32
    %c0_i32_1 = arith.constant 0 : i32
    return %c0_i32, %c0_i32_0 : i32, i32
  }
  func.func @transform_1(%arg0: i32) -> (i32, i32) {
    %c0_i32 = arith.constant 0 : i32
    %c0_i32_0 = arith.constant 0 : i32
    return %c0_i32, %arg0 : i32, i32
  }
  func.func @transform_2(%arg0: i32) -> (i32, i32) {
    %c0_i32 = arith.constant 0 : i32
    %c0_i32_0 = arith.constant 0 : i32
    %c0_i32_1 = arith.constant 0 : i32
    return %c0_i32, %c0_i32_0 : i32, i32
  }
  func.func @transform_3(%arg0: i32) -> (i32, i32) {
    %c0_i32 = arith.constant 0 : i32
    %c0_i32_0 = arith.constant 0 : i32
    return %c0_i32, %arg0 : i32, i32
  }
}

module attributes {stable_mosaic.version = 11 : i64} {
  func.func @_gemm_bias_act_kernel(%arg0: i32, %arg1: memref<16x72xbf16, #tpu.memory_space<vmem>>, %arg2: memref<72x128xbf16, #tpu.memory_space<vmem>>, %arg3: memref<16x1xf32, #tpu.memory_space<vmem>>, %arg4: memref<16x128xbf16, #tpu.memory_space<vmem>>) attributes {dimension_semantics = [#tpu.dimension_semantics<parallel>], iteration_bounds = array<i64: 1>, scalar_prefetch = 0 : i64, scratch_operands = 0 : i64, tpu.core_type = #tpu.core_type<tc>, window_params = [{pipeline_mode = #tpu.pipeline_mode<synchronous>, transform_indices = @transform_0, window_bounds = array<i64: 16, 72>}, {transform_indices = @transform_1, window_bounds = array<i64: 72, 128>}, {pipeline_mode = #tpu.pipeline_mode<synchronous>, transform_indices = @transform_2, window_bounds = array<i64: 16, 1>}, {transform_indices = @transform_3, window_bounds = array<i64: 16, 128>}]} {
    %c0 = arith.constant 0 : index
    %c0_0 = arith.constant 0 : index
    %0 = vector.load %arg1[%c0, %c0_0] : memref<16x72xbf16, #tpu.memory_space<vmem>>, vector<16x72xbf16>
    %c0_1 = arith.constant 0 : index
    %c0_2 = arith.constant 0 : index
    %1 = vector.load %arg2[%c0_1, %c0_2] : memref<72x128xbf16, #tpu.memory_space<vmem>>, vector<72x128xbf16>
    %cst = arith.constant dense<0.000000e+00> : vector<16x128xf32>
    %2 = tpu.matmul %0, %1, %cst {dimension_numbers = #tpu.dot_dimension_numbers<[1], [0], [0], [1], [0, 0, 1, 1], [], []>} : vector<16x72xbf16>, vector<72x128xbf16>, vector<16x128xf32> -> vector<16x128xf32>
    %c0_3 = arith.constant 0 : index
    %c0_4 = arith.constant 0 : index
    %3 = vector.load %arg3[%c0_3, %c0_4] : memref<16x1xf32, #tpu.memory_space<vmem>>, vector<16x1xf32>
    %4 = vector.broadcast %3 : vector<16x1xf32> to vector<16x128xf32>
    %5 = arith.addf %2, %4 : vector<16x128xf32>
    %cst_5 = arith.constant 0.000000e+00 : f32
    %6 = vector.broadcast %cst_5 : f32 to vector<16x128xf32>
    %7 = arith.maximumf %5, %6 : vector<16x128xf32>
    %8 = arith.truncf %7 : vector<16x128xf32> to vector<16x128xbf16>
    %c0_6 = arith.constant 0 : index
    %c0_7 = arith.constant 0 : index
    %9 = vector.load %arg4[%c0_6, %c0_7] : memref<16x128xbf16, #tpu.memory_space<vmem>>, vector<16x128xbf16>
    tpu.vector_store %arg4[%c0_6, %c0_7], %8 {strides = array<i32>} : memref<16x128xbf16, #tpu.memory_space<vmem>>, vector<16x128xbf16>,
    return
  }
  func.func @transform_0(%arg0: i32) -> (i32, i32) {
    %c0_i32 = arith.constant 0 : i32
    %c0_i32_0 = arith.constant 0 : i32
    %c0_i32_1 = arith.constant 0 : i32
    return %c0_i32, %c0_i32_0 : i32, i32
  }
  func.func @transform_1(%arg0: i32) -> (i32, i32) {
    %c0_i32 = arith.constant 0 : i32
    %c0_i32_0 = arith.constant 0 : i32
    return %c0_i32, %arg0 : i32, i32
  }
  func.func @transform_2(%arg0: i32) -> (i32, i32) {
    %c0_i32 = arith.constant 0 : i32
    %c0_i32_0 = arith.constant 0 : i32
    %c0_i32_1 = arith.constant 0 : i32
    return %c0_i32, %c0_i32_0 : i32, i32
  }
  func.func @transform_3(%arg0: i32) -> (i32, i32) {
    %c0_i32 = arith.constant 0 : i32
    %c0_i32_0 = arith.constant 0 : i32
    return %c0_i32, %arg0 : i32, i32
  }
}

module attributes {stable_mosaic.version = 11 : i64} {
  func.func @_latent_head_kernel(%arg0: i32, %arg1: memref<2x256xbf16, #tpu.memory_space<vmem>>, %arg2: memref<256x64xbf16, #tpu.memory_space<vmem>>, %arg3: memref<1x64xf32, #tpu.memory_space<vmem>>, %arg4: memref<2x32xf32, #tpu.memory_space<vmem>>, %arg5: memref<32x256xbf16, #tpu.memory_space<vmem>>, %arg6: memref<1x256xf32, #tpu.memory_space<vmem>>, %arg7: memref<2x64xf32, #tpu.memory_space<vmem>>, %arg8: memref<2x256xbf16, #tpu.memory_space<vmem>>) attributes {dimension_semantics = [#tpu.dimension_semantics<arbitrary>], iteration_bounds = array<i64: 1>, scalar_prefetch = 0 : i64, scratch_operands = 0 : i64, tpu.core_type = #tpu.core_type<tc>, window_params = [{pipeline_mode = #tpu.pipeline_mode<synchronous>, transform_indices = @transform_0, window_bounds = array<i64: 2, 256>}, {pipeline_mode = #tpu.pipeline_mode<synchronous>, transform_indices = @transform_1, window_bounds = array<i64: 256, 64>}, {pipeline_mode = #tpu.pipeline_mode<synchronous>, transform_indices = @transform_2, window_bounds = array<i64: 1, 64>}, {pipeline_mode = #tpu.pipeline_mode<synchronous>, transform_indices = @transform_3, window_bounds = array<i64: 2, 32>}, {pipeline_mode = #tpu.pipeline_mode<synchronous>, transform_indices = @transform_4, window_bounds = array<i64: 32, 256>}, {pipeline_mode = #tpu.pipeline_mode<synchronous>, transform_indices = @transform_5, window_bounds = array<i64: 1, 256>}, {pipeline_mode = #tpu.pipeline_mode<synchronous>, transform_indices = @transform_6, window_bounds = array<i64: 2, 64>}, {pipeline_mode = #tpu.pipeline_mode<synchronous>, transform_indices = @transform_7, window_bounds = array<i64: 2, 256>}]} {
    %c0 = arith.constant 0 : index
    %c0_0 = arith.constant 0 : index
    %0 = vector.load %arg1[%c0, %c0_0] : memref<2x256xbf16, #tpu.memory_space<vmem>>, vector<2x256xbf16>
    %c0_1 = arith.constant 0 : index
    %c0_2 = arith.constant 0 : index
    %1 = vector.load %arg2[%c0_1, %c0_2] : memref<256x64xbf16, #tpu.memory_space<vmem>>, vector<256x64xbf16>
    %cst = arith.constant dense<0.000000e+00> : vector<2x64xf32>
    %2 = tpu.matmul %0, %1, %cst {dimension_numbers = #tpu.dot_dimension_numbers<[1], [0], [0], [1], [0, 0, 1, 1], [], []>} : vector<2x256xbf16>, vector<256x64xbf16>, vector<2x64xf32> -> vector<2x64xf32>
    %c0_3 = arith.constant 0 : index
    %c0_4 = arith.constant 0 : index
    %3 = vector.load %arg3[%c0_3, %c0_4] : memref<1x64xf32, #tpu.memory_space<vmem>>, vector<1x64xf32>
    %4 = vector.broadcast %3 : vector<1x64xf32> to vector<2x64xf32>
    %5 = arith.addf %2, %4 : vector<2x64xf32>
    %6 = vector.extract_strided_slice %5 {offsets = [0, 0], sizes = [2, 32], strides = [1, 1]} : vector<2x64xf32> to vector<2x32xf32>
    %7 = vector.extract_strided_slice %5 {offsets = [0, 32], sizes = [2, 32], strides = [1, 1]} : vector<2x64xf32> to vector<2x32xf32>
    %c0_5 = arith.constant 0 : index
    %c0_6 = arith.constant 0 : index
    %8 = vector.load %arg4[%c0_5, %c0_6] : memref<2x32xf32, #tpu.memory_space<vmem>>, vector<2x32xf32>
    %cst_7 = arith.constant 5.000000e-01 : f32
    %9 = vector.broadcast %cst_7 : f32 to vector<2x32xf32>
    %10 = arith.mulf %9, %7 : vector<2x32xf32>
    %11 = math.exp %10 : vector<2x32xf32>
    %12 = arith.mulf %8, %11 : vector<2x32xf32>
    %13 = arith.addf %6, %12 : vector<2x32xf32>
    %14 = arith.truncf %13 : vector<2x32xf32> to vector<2x32xbf16>
    %c0_8 = arith.constant 0 : index
    %c0_9 = arith.constant 0 : index
    %15 = vector.load %arg5[%c0_8, %c0_9] : memref<32x256xbf16, #tpu.memory_space<vmem>>, vector<32x256xbf16>
    %cst_10 = arith.constant dense<0.000000e+00> : vector<2x256xf32>
    %16 = tpu.matmul %14, %15, %cst_10 {dimension_numbers = #tpu.dot_dimension_numbers<[1], [0], [0], [1], [0, 0, 1, 1], [], []>} : vector<2x32xbf16>, vector<32x256xbf16>, vector<2x256xf32> -> vector<2x256xf32>
    %c0_11 = arith.constant 0 : index
    %c0_12 = arith.constant 0 : index
    %17 = vector.load %arg6[%c0_11, %c0_12] : memref<1x256xf32, #tpu.memory_space<vmem>>, vector<1x256xf32>
    %18 = vector.broadcast %17 : vector<1x256xf32> to vector<2x256xf32>
    %19 = arith.addf %16, %18 : vector<2x256xf32>
    %c0_13 = arith.constant 0 : index
    %c0_14 = arith.constant 0 : index
    %20 = vector.load %arg7[%c0_13, %c0_14] : memref<2x64xf32, #tpu.memory_space<vmem>>, vector<2x64xf32>
    tpu.vector_store %arg7[%c0_13, %c0_14], %5 {strides = array<i32>} : memref<2x64xf32, #tpu.memory_space<vmem>>, vector<2x64xf32>,
    %21 = arith.truncf %19 : vector<2x256xf32> to vector<2x256xbf16>
    %c0_15 = arith.constant 0 : index
    %c0_16 = arith.constant 0 : index
    %22 = vector.load %arg8[%c0_15, %c0_16] : memref<2x256xbf16, #tpu.memory_space<vmem>>, vector<2x256xbf16>
    tpu.vector_store %arg8[%c0_15, %c0_16], %21 {strides = array<i32>} : memref<2x256xbf16, #tpu.memory_space<vmem>>, vector<2x256xbf16>,
    return
  }
  func.func @transform_0(%arg0: i32) -> (i32, i32) {
    %c0_i32 = arith.constant 0 : i32
    %c0_i32_0 = arith.constant 0 : i32
    %c0_i32_1 = arith.constant 0 : i32
    return %c0_i32, %c0_i32_0 : i32, i32
  }
  func.func @transform_1(%arg0: i32) -> (i32, i32) {
    %c0_i32 = arith.constant 0 : i32
    %c0_i32_0 = arith.constant 0 : i32
    %c0_i32_1 = arith.constant 0 : i32
    return %c0_i32, %c0_i32_0 : i32, i32
  }
  func.func @transform_2(%arg0: i32) -> (i32, i32) {
    %c0_i32 = arith.constant 0 : i32
    %c0_i32_0 = arith.constant 0 : i32
    %c0_i32_1 = arith.constant 0 : i32
    return %c0_i32, %c0_i32_0 : i32, i32
  }
  func.func @transform_3(%arg0: i32) -> (i32, i32) {
    %c0_i32 = arith.constant 0 : i32
    %c0_i32_0 = arith.constant 0 : i32
    %c0_i32_1 = arith.constant 0 : i32
    return %c0_i32, %c0_i32_0 : i32, i32
  }
  func.func @transform_4(%arg0: i32) -> (i32, i32) {
    %c0_i32 = arith.constant 0 : i32
    %c0_i32_0 = arith.constant 0 : i32
    %c0_i32_1 = arith.constant 0 : i32
    return %c0_i32, %c0_i32_0 : i32, i32
  }
  func.func @transform_5(%arg0: i32) -> (i32, i32) {
    %c0_i32 = arith.constant 0 : i32
    %c0_i32_0 = arith.constant 0 : i32
    %c0_i32_1 = arith.constant 0 : i32
    return %c0_i32, %c0_i32_0 : i32, i32
  }
  func.func @transform_6(%arg0: i32) -> (i32, i32) {
    %c0_i32 = arith.constant 0 : i32
    %c0_i32_0 = arith.constant 0 : i32
    %c0_i32_1 = arith.constant 0 : i32
    return %c0_i32, %c0_i32_0 : i32, i32
  }
  func.func @transform_7(%arg0: i32) -> (i32, i32) {
    %c0_i32 = arith.constant 0 : i32
    %c0_i32_0 = arith.constant 0 : i32
    %c0_i32_1 = arith.constant 0 : i32
    return %c0_i32, %c0_i32_0 : i32, i32
  }
}

module attributes {stable_mosaic.version = 11 : i64} {
  func.func @_gemm_bias_act_kernel(%arg0: i32, %arg1: memref<128x16xbf16, #tpu.memory_space<vmem>>, %arg2: memref<16x128xbf16, #tpu.memory_space<vmem>>, %arg3: memref<128x1xf32, #tpu.memory_space<vmem>>, %arg4: memref<128x128xbf16, #tpu.memory_space<vmem>>) attributes {dimension_semantics = [#tpu.dimension_semantics<parallel>], iteration_bounds = array<i64: 1>, scalar_prefetch = 0 : i64, scratch_operands = 0 : i64, tpu.core_type = #tpu.core_type<tc>, window_params = [{pipeline_mode = #tpu.pipeline_mode<synchronous>, transform_indices = @transform_0, window_bounds = array<i64: 128, 16>}, {transform_indices = @transform_1, window_bounds = array<i64: 16, 128>}, {pipeline_mode = #tpu.pipeline_mode<synchronous>, transform_indices = @transform_2, window_bounds = array<i64: 128, 1>}, {transform_indices = @transform_3, window_bounds = array<i64: 128, 128>}]} {
    %c0 = arith.constant 0 : index
    %c0_0 = arith.constant 0 : index
    %0 = vector.load %arg1[%c0, %c0_0] : memref<128x16xbf16, #tpu.memory_space<vmem>>, vector<128x16xbf16>
    %c0_1 = arith.constant 0 : index
    %c0_2 = arith.constant 0 : index
    %1 = vector.load %arg2[%c0_1, %c0_2] : memref<16x128xbf16, #tpu.memory_space<vmem>>, vector<16x128xbf16>
    %cst = arith.constant dense<0.000000e+00> : vector<128x128xf32>
    %2 = tpu.matmul %0, %1, %cst {dimension_numbers = #tpu.dot_dimension_numbers<[1], [0], [0], [1], [0, 0, 1, 1], [], []>} : vector<128x16xbf16>, vector<16x128xbf16>, vector<128x128xf32> -> vector<128x128xf32>
    %c0_3 = arith.constant 0 : index
    %c0_4 = arith.constant 0 : index
    %3 = vector.load %arg3[%c0_3, %c0_4] : memref<128x1xf32, #tpu.memory_space<vmem>>, vector<128x1xf32>
    %4 = vector.broadcast %3 : vector<128x1xf32> to vector<128x128xf32>
    %5 = arith.addf %2, %4 : vector<128x128xf32>
    %6 = arith.truncf %5 : vector<128x128xf32> to vector<128x128xbf16>
    %c0_5 = arith.constant 0 : index
    %c0_6 = arith.constant 0 : index
    %7 = vector.load %arg4[%c0_5, %c0_6] : memref<128x128xbf16, #tpu.memory_space<vmem>>, vector<128x128xbf16>
    tpu.vector_store %arg4[%c0_5, %c0_6], %6 {strides = array<i32>} : memref<128x128xbf16, #tpu.memory_space<vmem>>, vector<128x128xbf16>,
    return
  }
  func.func @transform_0(%arg0: i32) -> (i32, i32) {
    %c0_i32 = arith.constant 0 : i32
    %c0_i32_0 = arith.constant 0 : i32
    %c0_i32_1 = arith.constant 0 : i32
    return %c0_i32, %c0_i32_0 : i32, i32
  }
  func.func @transform_1(%arg0: i32) -> (i32, i32) {
    %c0_i32 = arith.constant 0 : i32
    %c0_i32_0 = arith.constant 0 : i32
    return %c0_i32, %arg0 : i32, i32
  }
  func.func @transform_2(%arg0: i32) -> (i32, i32) {
    %c0_i32 = arith.constant 0 : i32
    %c0_i32_0 = arith.constant 0 : i32
    %c0_i32_1 = arith.constant 0 : i32
    return %c0_i32, %c0_i32_0 : i32, i32
  }
  func.func @transform_3(%arg0: i32) -> (i32, i32) {
    %c0_i32 = arith.constant 0 : i32
    %c0_i32_0 = arith.constant 0 : i32
    return %c0_i32, %arg0 : i32, i32
  }
}

module attributes {stable_mosaic.version = 11 : i64} {
  func.func @_gemm_bias_act_kernel(%arg0: i32, %arg1: memref<64x8xbf16, #tpu.memory_space<vmem>>, %arg2: memref<8x128xbf16, #tpu.memory_space<vmem>>, %arg3: memref<64x1xf32, #tpu.memory_space<vmem>>, %arg4: memref<64x128xbf16, #tpu.memory_space<vmem>>) attributes {dimension_semantics = [#tpu.dimension_semantics<parallel>], iteration_bounds = array<i64: 1>, scalar_prefetch = 0 : i64, scratch_operands = 0 : i64, tpu.core_type = #tpu.core_type<tc>, window_params = [{pipeline_mode = #tpu.pipeline_mode<synchronous>, transform_indices = @transform_0, window_bounds = array<i64: 64, 8>}, {transform_indices = @transform_1, window_bounds = array<i64: 8, 128>}, {pipeline_mode = #tpu.pipeline_mode<synchronous>, transform_indices = @transform_2, window_bounds = array<i64: 64, 1>}, {transform_indices = @transform_3, window_bounds = array<i64: 64, 128>}]} {
    %c0 = arith.constant 0 : index
    %c0_0 = arith.constant 0 : index
    %0 = vector.load %arg1[%c0, %c0_0] : memref<64x8xbf16, #tpu.memory_space<vmem>>, vector<64x8xbf16>
    %c0_1 = arith.constant 0 : index
    %c0_2 = arith.constant 0 : index
    %1 = vector.load %arg2[%c0_1, %c0_2] : memref<8x128xbf16, #tpu.memory_space<vmem>>, vector<8x128xbf16>
    %cst = arith.constant dense<0.000000e+00> : vector<64x128xf32>
    %2 = tpu.matmul %0, %1, %cst {dimension_numbers = #tpu.dot_dimension_numbers<[1], [0], [0], [1], [0, 0, 1, 1], [], []>} : vector<64x8xbf16>, vector<8x128xbf16>, vector<64x128xf32> -> vector<64x128xf32>
    %c0_3 = arith.constant 0 : index
    %c0_4 = arith.constant 0 : index
    %3 = vector.load %arg3[%c0_3, %c0_4] : memref<64x1xf32, #tpu.memory_space<vmem>>, vector<64x1xf32>
    %4 = vector.broadcast %3 : vector<64x1xf32> to vector<64x128xf32>
    %5 = arith.addf %2, %4 : vector<64x128xf32>
    %6 = arith.truncf %5 : vector<64x128xf32> to vector<64x128xbf16>
    %c0_5 = arith.constant 0 : index
    %c0_6 = arith.constant 0 : index
    %7 = vector.load %arg4[%c0_5, %c0_6] : memref<64x128xbf16, #tpu.memory_space<vmem>>, vector<64x128xbf16>
    tpu.vector_store %arg4[%c0_5, %c0_6], %6 {strides = array<i32>} : memref<64x128xbf16, #tpu.memory_space<vmem>>, vector<64x128xbf16>,
    return
  }
  func.func @transform_0(%arg0: i32) -> (i32, i32) {
    %c0_i32 = arith.constant 0 : i32
    %c0_i32_0 = arith.constant 0 : i32
    %c0_i32_1 = arith.constant 0 : i32
    return %c0_i32, %c0_i32_0 : i32, i32
  }
  func.func @transform_1(%arg0: i32) -> (i32, i32) {
    %c0_i32 = arith.constant 0 : i32
    %c0_i32_0 = arith.constant 0 : i32
    return %c0_i32, %arg0 : i32, i32
  }
  func.func @transform_2(%arg0: i32) -> (i32, i32) {
    %c0_i32 = arith.constant 0 : i32
    %c0_i32_0 = arith.constant 0 : i32
    %c0_i32_1 = arith.constant 0 : i32
    return %c0_i32, %c0_i32_0 : i32, i32
  }
  func.func @transform_3(%arg0: i32) -> (i32, i32) {
    %c0_i32 = arith.constant 0 : i32
    %c0_i32_0 = arith.constant 0 : i32
    return %c0_i32, %arg0 : i32, i32
  }
}

</mosaic_0001>

<bundles_post_ra>
// kernel: forward.7
= control target key start
LH: loop header
LB: loop body
LE: loop exit
PB: predicated region body
PF: predicated region fallthrough
CT: control target
= control target key end

     0   :  { %v122_v0 = vmov 0.0   ;;  %vm123_vm0 = vmmov 0   ;;  %v124_v2 = vmov 0   ;;  %vm46_vm1 = vcmask 1041408   ;;  %s163_s1 = inlined_call_operand.vmem [shape: bf16[36,128], index: 1, kind: input, shape index: {}]   ;;  %s164_s2 = inlined_call_operand.vmem [shape: f32[8,1], index: 2, kind: input, shape index: {}]   ;;  %s165_s0 = inlined_call_operand.vmem [shape: bf16[8,36], index: 0, kind: input, shape index: {}]   ;;  %s166_s3 = inlined_call_operand.vmem [shape: bf16[8,128], index: 3, kind: output, shape index: {}]  }
   0x1   :  { %105 = vmatprep.subr.bf16.mxu0 %v122_v0  ;;  %v119_v1 = vld [vmem:[%s163_s1] sm:$0xff]   ;;  %111 = vmatprep.mubr.msk.bf16.mxu0 %vm123_vm0, %v122_v0  ;;  %v120_v3 = vld [vmem:[%s163_s1 + $0x8] sm:$0xff]   ;;  %v121_v5 = vld [vmem:[%s163_s1 + $0x10] ss:$0 sps:$4 sm:$0x33]   ;;  %vm42_vm2 = vcmask 293888  }
   0x2   :  { %118 = vset.pattern.permute.xlu0 %v124_v2  ;;  %106 = vmatpush3.bf16.msra.mxu0 %v119_v1  ;;  %v21_v4 = vld [vmem:[%s164_s2] sm:$0xff]  ;;  %v48_v6 = vsel %vm46_vm1, %v121_v5, 0 }
   0x3   :  { %107 = vmatprep.subr.bf16.mxu0 %v122_v0  ;;  %24 = vperm.xlu0 %118, %v21_v4   ;;  %v15_v7 = vld [vmem:[%s165_s0] sm:$0xf] }
   0x6   :  { %108 = vmatpush3.bf16.msra.mxu0 %v120_v3 }
   0x7   :  { %109 = vmatprep.subr.bf16.mxu0 %v122_v0 }
   0xa   :  { %110 = vmatpush3.bf16.msra.mxu0 %v48_v6 }
   0xd   :  { %112 = vmatmul.mubr.msk.bf16.vlgmr.msra.gmra.mrb[0].mxu0 %vm42_vm2, %v15_v7 }
  0x82   :  { %v25_v8 = vpop.permute.xlu0 %24 }
  0xe0   :  { %v84_v9 = vpop.f32.mrb[0].mxu0 }
  0xe1   :  { %v85_v10 = vadd.f32 %v84_v9, %v25_v8  ;;  %v113_v11 = vpop.f32.mrb[1].mxu0 }
  0xe2   :  { %v87_v12 = vpop.f32.mrb[2].mxu0 }
  0xe3   :  { %v90_v13 = vmax.f32 %v85_v10, 0.0  ;;  %v114_v14 = vpop.f32.mrb[3].mxu0 }
  0xe5   :  { %v91_v15 = vpack.c.bf16 %v90_v13, %v90_v13 }
  0xe7   :  { %92 = vst [vmem:[%s166_s3] sm:$0xf] %v91_v15 }

// kernel: forward.10
= control target key start
LH: loop header
LB: loop body
LE: loop exit
PB: predicated region body
PF: predicated region fallthrough
CT: control target
= control target key end

     0   :  { %s458_s0 = inlined_call_operand.vmem [shape: bf16[16,72], index: 0, kind: input, shape index: {}]   ;;  %s459_s1 = inlined_call_operand.vmem [shape: f32[16,1], index: 1, kind: input, shape index: {}]   ;;  %s460_s2 = inlined_call_operand.vmem [shape: bf16[72,32], index: 2, kind: input, shape index: {}]   ;;  %s461_s3 = inlined_call_operand.<no memory space> [shape: bf16[], index: 3, kind: input, shape index: {}]   ;;  %s462_s4 = inlined_call_operand.vmem [shape: bf16[16,128], index: 4, kind: output, shape index: {}]  }
   0x1   :  { %v9_v0 = vstv %s461_s3 }
   0x2   :  { %v10_v1 = vunpack.i.l.bf16 %v9_v0 }
   0x3   :  { %v29_v2 = vld [vmem:[%s460_s2] sm:$0xff]   ;;  %v32_v3 = vlaneseq  ;;  %v338_v4 = vld [vmem:[%s460_s2 + $0x8] sm:$0xff]   ;;  %v340_v5 = vld [vmem:[%s460_s2 + $0x10] sm:$0xff]   ;;  %v391_v6 = vmov 0.0   ;;  %vm392_vm0 = vmmov 0   ;;  %v393_v20 = vmov 0  }
   0x4   :  { %367 = vmatprep.subr.bf16.mxu0 %v391_v6  ;;  %v30_v7 = vunpack.c.l.bf16 %v29_v2  ;;  %v51_v8 = vunpack.c.h.bf16 %v29_v2  ;;  %v73_v9 = vunpack.c.l.bf16 %v338_v4  ;;  %v95_v10 = vunpack.c.h.bf16 %v338_v4  ;;  %v342_v11 = vld [vmem:[%s460_s2 + $0x18] sm:$0xff]   ;;  %v344_v12 = vld [vmem:[%s460_s2 + $0x20] sm:$0xf]  ;;  %377 = vmatprep.mubr.msk.bf16.mxu0 %vm392_vm0, %v391_v6  ;;  %v229_v29 = vld [vmem:[%s459_s1 + $0x8] sm:$0xff] }
   0x5   :  { %v33_v13 = vand.u32 127, %v32_v3  ;;  %v117_v14 = vunpack.c.l.bf16 %v340_v5  ;;  %v228_v15 = vld [vmem:[%s459_s1] sm:$0xff]  ;;  %v139_v16 = vunpack.c.h.bf16 %v340_v5  ;;  %v161_v17 = vunpack.c.l.bf16 %v342_v11  ;;  %384 = vset.pattern.permute.xlu0 %v393_v20 }
   0x6   :  { %v183_v18 = vunpack.c.h.bf16 %v342_v11  ;;  %v205_v19 = vunpack.c.l.bf16 %v344_v12  ;;  %232 = vperm.xlu0 %384, %v228_v15   ;;  %vm276_vm2 = vcmask 1043456   ;;  %v390_v46 = vld [vmem:[%s458_s0] sm:$0xff]   ;;  %vm272_vm3 = vcmask 588800  }
   0x7   :  { %vm35_vm1 = vcmp.lt.s32.totalorder %v33_v13, 32 }
   0x8   :  { %v36_v21 = vsel %vm35_vm1, %v30_v7, %v10_v1  ;;  %v57_v22 = vsel %vm35_vm1, %v51_v8, %v10_v1  ;;  %v79_v23 = vsel %vm35_vm1, %v73_v9, %v10_v1  ;;  %v101_v24 = vsel %vm35_vm1, %v95_v10, %v10_v1 }
   0x9   :  { %v37_v25 = vpack.c.bf16 %v391_v6, %v36_v21  ;;  %v59_v26 = vpack.c.bf16 %v391_v6, %v57_v22  ;;  %v81_v27 = vpack.c.bf16 %v391_v6, %v79_v23  ;;  %v103_v28 = vpack.c.bf16 %v391_v6, %v101_v24 }
   0xa   :  { %v123_v30 = vsel %vm35_vm1, %v117_v14, %v10_v1  ;;  %v145_v31 = vsel %vm35_vm1, %v139_v16, %v10_v1  ;;  %v167_v32 = vsel %vm35_vm1, %v161_v17, %v10_v1  ;;  %v189_v33 = vsel %vm35_vm1, %v183_v18, %v10_v1  ;;  %237 = vperm.xlu0 %384, %v229_v29  }
   0xb   :  { %39 = vst [vmem:[#allocation7] sm:$0xf] %v37_v25  ;;  %61 = vst [vmem:[#allocation7 + $0x4] sm:$0xf] %v59_v26  ;;  %v125_v34 = vpack.c.bf16 %v391_v6, %v123_v30  ;;  %v147_v35 = vpack.c.bf16 %v391_v6, %v145_v31  ;;  %v169_v36 = vpack.c.bf16 %v391_v6, %v167_v32 }
   0xc   :  { %83 = vst [vmem:[#allocation7 + $0x8] sm:$0xf] %v81_v27  ;;  %105 = vst [vmem:[#allocation7 + $0xc] sm:$0xf] %v103_v28  ;;  %v191_v37 = vpack.c.bf16 %v391_v6, %v189_v33  ;;  %v211_v38 = vsel %vm35_vm1, %v205_v19, %v10_v1 }
   0xd   :  { %127 = vst [vmem:[#allocation7 + $0x10] sm:$0xf] %v125_v34  ;;  %149 = vst [vmem:[#allocation7 + $0x14] sm:$0xf] %v147_v35  ;;  %v213_v39 = vpack.c.bf16 %v391_v6, %v211_v38 }
   0xe   :  { %171 = vst [vmem:[#allocation7 + $0x18] sm:$0xf] %v169_v36  ;;  %193 = vst [vmem:[#allocation7 + $0x1c] sm:$0xf] %v191_v37 }
   0xf   :  { %215 = vst [vmem:[#allocation7 + $0x20] sm:$0xf] %v213_v39 }
  0x12   :  { %v385_v40 = vld [vmem:[#allocation7] sm:$0xff]  }
  0x13   :  { %368 = vmatpush3.bf16.msra.mxu0 %v385_v40  ;;  %v386_v41 = vld [vmem:[#allocation7 + $0x8] sm:$0xff]  }
  0x14   :  { %369 = vmatprep.subr.bf16.mxu0 %v391_v6  ;;  %v387_v42 = vld [vmem:[#allocation7 + $0x10] sm:$0xff]  }
  0x15   :  { %v388_v43 = vld [vmem:[#allocation7 + $0x18] sm:$0xff]  }
  0x16   :  { %v389_v44 = vld [vmem:[#allocation7 + $0x20] ss:$0 sps:$4 sm:$0xff]  }
  0x17   :  { %370 = vmatpush3.bf16.msra.mxu0 %v386_v41  ;;  %v278_v45 = vsel %vm276_vm2, %v389_v44, 0 }
  0x18   :  { %371 = vmatprep.subr.bf16.mxu0 %v391_v6 }
  0x1b   :  { %372 = vmatpush3.bf16.msra.mxu0 %v387_v42 }
  0x1c   :  { %373 = vmatprep.subr.bf16.mxu0 %v391_v6 }
  0x1f   :  { %374 = vmatpush3.bf16.msra.mxu0 %v388_v43 }
  0x20   :  { %375 = vmatprep.subr.bf16.mxu0 %v391_v6 }
  0x23   :  { %376 = vmatpush3.bf16.msra.mxu0 %v278_v45 }
  0x26   :  { %378 = vmatmul.mubr.msk.bf16.vlgmr.msra.gmra.mrb[0].mxu0 %vm272_vm3, %v390_v46 }
  0x85   :  { %v233_v47 = vpop.permute.xlu0 %232 }
  0x89   :  { %v238_v51 = vpop.permute.xlu0 %237 }
  0xf9   :  { %v314_v48 = vpop.f32.mrb[0].mxu0 }
  0xfa   :  { %v315_v49 = vadd.f32 %v314_v48, %v233_v47  ;;  %v379_v50 = vpop.f32.mrb[1].mxu0 }
  0xfb   :  { %v317_v52 = vpop.f32.mrb[2].mxu0 }
  0xfc   :  { %v318_v53 = vadd.f32 %v317_v52, %v238_v51  ;;  %v380_v54 = vpop.f32.mrb[3].mxu0  ;;  %v321_v55 = vmax.f32 %v315_v49, 0.0 }
  0xfe   :  { %v322_v56 = vmax.f32 %v318_v53, 0.0 }
 0x100   :  { %v359_v57 = vpack.c.bf16 %v322_v56, %v321_v55 }
 0x102   :  { %360 = vst [vmem:[%s462_s4] sm:$0xff] %v359_v57  }

// kernel: forward.8
= control target key start
LH: loop header
LB: loop body
LE: loop exit
PB: predicated region body
PF: predicated region fallthrough
CT: control target
= control target key end

     0   :  { %v424_v6 = vmov 1966171168   ;;  %v78_v8 = vlaneseq  ;;  %vm319_vm0 = vcmask 517120   ;;  %v425_v39 = vmov 0   ;;  %s426_s21 = smov 96   ;;  %s555_s1 = inlined_call_operand.vmem [shape: bf16[256,64], index: 1, kind: input, shape index: {}]   ;;  %s556_s0 = inlined_call_operand.vmem [shape: bf16[2,256], index: 0, kind: input, shape index: {}]   ;;  %s557_s4 = inlined_call_operand.vmem [shape: bf16[32,256], index: 4, kind: input, shape index: {}]   ;;  %s558_s2 = inlined_call_operand.vmem [shape: f32[1,64], index: 2, kind: input, shape index: {}]   ;;  %s559_s6 = inlined_call_operand.vmem [shape: f32[2,64], index: 6, kind: output, shape index: {0}]   ;;  %s560_s3 = inlined_call_operand.vmem [shape: f32[2,32], index: 3, kind: input, shape index: {}]   ;;  %s561_s5 = inlined_call_operand.vmem [shape: f32[1,256], index: 5, kind: input, shape index: {}]   ;;  %s562_s7 = inlined_call_operand.vmem [shape: bf16[2,256], index: 7, kind: output, shape index: {1}]  }
   0x1   :  { %v400_v0 = vld [vmem:[%s555_s1 + $0x40] sm:$0xff]   ;;  %v402_v2 = vld [vmem:[%s555_s1 + $0x48] sm:$0xff]   ;;  %v404_v4 = vld [vmem:[%s555_s1 + $0x50] sm:$0xff]   ;;  %v76_v7 = vunpack.c.l.s4 %v424_v6  ;;  %310 = vmatprep.mubr.bf16.mxu1 %v425_v39  ;;  %vm274_vm1 = vcmask 261120  }
   0x2   :  { %v401_v1 = vld [vmem:[%s555_s1] sm:$0xff]   ;;  %375 = vmatprep.subr.bf16.mxu0 %v400_v0  ;;  %v403_v3 = vld [vmem:[%s555_s1 + $0x8] sm:$0xff]   ;;  %v405_v5 = vld [vmem:[%s555_s1 + $0x10] sm:$0xff]   ;;  %v491_v12 = vshrl.u32 %v78_v8, 7 }
   0x3   :  { %376 = vmatpush3.bf16.msra.mxu0 %v401_v1  ;;  %v406_v9 = vld [vmem:[%s555_s1 + $0x58] sm:$0xff]   ;;  %v77_v11 = vunpack.c.0.s8 %v76_v7  ;;  %v408_v13 = vld [vmem:[%s555_s1 + $0x60] sm:$0xff]   ;;  %v410_v16 = vld [vmem:[%s555_s1 + $0x68] sm:$0xff]  }
   0x4   :  { %377 = vmatprep.subr.bf16.mxu0 %v402_v2  ;;  %v407_v10 = vld [vmem:[%s555_s1 + $0x18] sm:$0xff]   ;;  %v409_v14 = vld [vmem:[%s555_s1 + $0x20] sm:$0xff]   ;;  %v411_v19 = vld [vmem:[%s555_s1 + $0x28] sm:$0xff]   ;;  %v246_v46 = vsub.s32 0, %v491_v12  ;;  %v250_v48 = vsub.s32 1, %v491_v12 }
   0x5   :  { %v500_v15 = vsub.s32 %v77_v11, %v491_v12  ;;  %v351_v17 = vld.sshfl [vmem:[%s556_s0] sm:$0x11 pattern:$0x75316420]  ;;  %v412_v21 = vld [vmem:[%s555_s1 + $0x70] sm:$0xff]   ;;  %v414_v23 = vld [vmem:[%s555_s1 + $0x78] sm:$0xff]  }
   0x6   :  { %v74_v18 = vcombine.high %v351_v17, %v351_v17  ;;  %v413_v22 = vld [vmem:[%s555_s1 + $0x30] sm:$0xff]   ;;  %v415_v24 = vld [vmem:[%s555_s1 + $0x38] sm:$0xff]   ;;  %v416_v26 = vld [vmem:[%s557_s4 + $0x4] ss:$8 sps:$4 sm:$0xff]  }
   0x7   :  { %378 = vmatpush3.bf16.msra.mxu0 %v403_v3  ;;  %v81_v25 = vrot.slane %v351_v17, %v500_v15  ;;  %278 = vmatprep.subr.bf16.mxu1 %v416_v26  ;;  %v350_v28 = vld [vmem:[%s558_s2] ss:$0 sm:$0xff]  ;;  %v419_v37 = vld [vmem:[%s557_s4 + $0x14] ss:$8 sps:$4 sm:$0xff]   ;;  %v421_v38 = vld [vmem:[%s557_s4 + $0x10] ss:$8 sps:$4 sm:$0xff]  }
   0x8   :  { %379 = vmatprep.subr.bf16.mxu0 %v404_v4  ;;  %v88_v20 = vrot.slane %v74_v18, %v500_v15  ;;  %v418_v34 = vld [vmem:[%s557_s4] ss:$8 sps:$4 sm:$0xff]  }
   0x9   :  { %279 = vmatpush1.bf16.msra.mxu1 %v418_v34  ;;  %v227_v41 = vld [vmem:[%s560_s3] sm:$0x3] }
   0xa   :  { %219 = vmatprep.mubr.bf16.mxu0 %v88_v20  ;;  %280 = vmatprep.subr.bf16.mxu1 %v419_v37  ;;  %v242_v47 = vld [vmem:[%s561_s5] sm:$0x3] }
   0xb   :  { %380 = vmatpush3.bf16.msra.mxu0 %v405_v5  ;;  %v247_v49 = vrot.slane %v242_v47, %v246_v46  ;;  %v251_v50 = vrot.slane %v242_v47, %v250_v48 }
   0xc   :  { %381 = vmatprep.subr.bf16.mxu0 %v406_v9 }
   0xd   :  { %281 = vmatpush1.bf16.msra.mxu1 %v421_v38 }
   0xf   :  { %382 = vmatpush3.bf16.msra.mxu0 %v407_v10 }
  0x10   :  { %383 = vmatprep.subr.bf16.mxu0 %v408_v13 }
  0x13   :  { %384 = vmatpush3.bf16.msra.mxu0 %v409_v14 }
  0x14   :  { %385 = vmatprep.subr.bf16.mxu0 %v410_v16 }
  0x17   :  { %386 = vmatpush3.bf16.msra.mxu0 %v411_v19 }
  0x18   :  { %387 = vmatprep.subr.bf16.mxu0 %v412_v21 }
  0x1b   :  { %388 = vmatpush3.bf16.msra.mxu0 %v413_v22 }
  0x1c   :  { %389 = vmatprep.subr.bf16.mxu0 %v414_v23 }
  0x1f   :  { %390 = vmatpush3.bf16.msra.mxu0 %v415_v24 }
  0x22   :  { %220 = vmatmul.mubr.bf16.vlgmr.msra.gmra.mrb[0].mxu0 %v81_v25 }
  0xf5   :  { %v391_v27 = vpop.f32.mrb[0].mxu0 }
  0xf6   :  { %v392_v29 = vpop.f32.mrb[1].mxu0 }
  0xf7   :  { %v393_v30 = vadd.f32 %v392_v29, %v391_v27  ;;  %v394_v31 = vpop.f32.mrb[2].mxu0 }
  0xf8   :  { %v395_v32 = vpop.f32.mrb[3].mxu0 }
  0xf9   :  { %v222_v33 = vadd.f32 %v393_v30, %v350_v28 }
  0xfb   :  { %v228_v35 = vmul.f32 0.5, %v222_v33  ;;  %320 = vst.msk [vmem:[%s559_s6] sm:$0x3] %vm319_vm0, %v222_v33 }
  0xfd   :  { %v229_v36 = vmul.f32 1.442695, %v228_v35 }
  0xff   :  { %422 = vpow2.f32 %v229_v36 }
 0x109   :  { %v423_v40 = vpop.eup %422 }
 0x10a   :  { %232 = vrot.lane.b32.xlu0 %v423_v40, %s426_s21 }
 0x17c   :  { %v233_v42 = vpop.permute.xlu0 %232 }
 0x17d   :  { %v235_v43 = vmul.f32 %v233_v42, %v227_v41 }
 0x17f   :  { %v236_v44 = vadd.f32 %v235_v43, %v222_v33 }
 0x181   :  { %v237_v45 = vpack.c.bf16 %v236_v44, %v236_v44 }
 0x183   :  { %372 = vmatmul.mubr.msk.bf16.vlgmr.msra.gmra.mrb[0].mxu1 %vm274_vm1, %v237_v45 }
 0x256   :  { %v312_v51 = vpop.f32.mrb[0].mxu1 }
 0x257   :  { %v313_v52 = vadd.f32 %v312_v51, %v247_v49  ;;  %v314_v53 = vpop.f32.mrb[1].mxu1 }
 0x258   :  { %v315_v54 = vadd.f32 %v314_v53, %v251_v50  ;;  %v316_v55 = vpop.f32.mrb[2].mxu1 }
 0x259   :  { %v317_v56 = vpop.f32.mrb[3].mxu1 }
 0x25a   :  { %v373_v57 = vpack.c.bf16 %v315_v54, %v313_v52 }
 0x25c   :  { %v332_v58 = vrot.slane %v373_v57, %v500_v15 }
 0x25e   :  { %374 = vst.sshfl [vmem:[%s562_s7] sm:$0x5 pattern:$0x73625140] %v332_v58 }

// kernel: forward.11
= control target key start
LH: loop header
LB: loop body
LE: loop exit
PB: predicated region body
PF: predicated region fallthrough
CT: control target
= control target key end

     0   :  { %s705_s0 = inlined_call_operand.vmem [shape: bf16[128,16], index: 0, kind: input, shape index: {}]   ;;  %s706_s1 = inlined_call_operand.vmem [shape: f32[128,1], index: 1, kind: input, shape index: {}]   ;;  %s707_s2 = inlined_call_operand.vmem [shape: bf16[16,32], index: 2, kind: input, shape index: {}]   ;;  %s708_s3 = inlined_call_operand.<no memory space> [shape: bf16[], index: 3, kind: input, shape index: {}]   ;;  %s709_s4 = inlined_call_operand.vmem [shape: bf16[128,128], index: 4, kind: output, shape index: {}]  }
   0x1   :  { %v9_v0 = vstv %s708_s3 }
   0x2   :  { %v10_v1 = vunpack.i.l.bf16 %v9_v0 }
   0x3   :  { %v29_v2 = vld [vmem:[%s707_s2] sm:$0xff]   ;;  %v32_v3 = vlaneseq  ;;  %vm223_vm0 = vcmask 130048   ;;  %v568_v9 = vmov 0   ;;  %v569_v12 = vmov 0.0   ;;  %v83_v15 = vld [vmem:[%s706_s1 + $0x10] sm:$0xff]  ;;  %v84_v17 = vld [vmem:[%s706_s1 + $0x18] sm:$0xff] }
   0x4   :  { %v30_v4 = vunpack.c.l.bf16 %v29_v2  ;;  %v51_v5 = vunpack.c.h.bf16 %v29_v2  ;;  %v560_v6 = vld [vmem:[%s705_s0] sm:$0xff]   ;;  %558 = vset.pattern.permute.xlu1 %v568_v9  ;;  %557 = vset.pattern.permute.xlu0 %v568_v9  ;;  %v82_v18 = vld [vmem:[%s706_s1 + $0x8] sm:$0xff]  ;;  %v564_v24 = vld [vmem:[%s705_s0 + $0x10] sm:$0xff]  }
   0x5   :  { %v33_v7 = vand.u32 127, %v32_v3  ;;  %v561_v8 = vld [vmem:[%s705_s0 + $0x20] sm:$0xff]   ;;  %537 = vmatprep.mubr.msk.bf16.mxu0 %vm223_vm0, %v560_v6  ;;  %109 = vperm.xlu1 %558, %v83_v15   ;;  %v86_v20 = vld [vmem:[%s706_s1 + $0x28] sm:$0xff]  ;;  %v565_v25 = vld [vmem:[%s705_s0 + $0x30] sm:$0xff]  }
   0x6   :  { %545 = vmatprep.mubr.msk.bf16.mxu1 %vm223_vm0, %v561_v8  ;;  %v81_v16 = vld [vmem:[%s706_s1] sm:$0xff]  ;;  %v562_v22 = vld [vmem:[%s705_s0 + $0x8] sm:$0xff]   ;;  %v88_v26 = vld [vmem:[%s706_s1 + $0x38] sm:$0xff] }
   0x7   :  { %vm35_vm1 = vcmp.lt.s32.totalorder %v33_v7, 32  ;;  %99 = vperm.xlu0 %557, %v81_v16   ;;  %v85_v21 = vld [vmem:[%s706_s1 + $0x20] sm:$0xff]  ;;  %v563_v23 = vld [vmem:[%s705_s0 + $0x28] sm:$0xff]   ;;  %v87_v27 = vld [vmem:[%s706_s1 + $0x30] sm:$0xff] }
   0x8   :  { %v36_v10 = vsel %vm35_vm1, %v30_v4, %v10_v1  ;;  %v57_v11 = vsel %vm35_vm1, %v51_v5, %v10_v1  ;;  %v90_v28 = vld [vmem:[%s706_s1 + $0x48] sm:$0xff]  ;;  %v89_v29 = vld [vmem:[%s706_s1 + $0x40] sm:$0xff]  ;;  %v566_v30 = vld [vmem:[%s705_s0 + $0x18] sm:$0xff]  }
   0x9   :  { %v37_v13 = vpack.c.bf16 %v569_v12, %v36_v10  ;;  %v59_v14 = vpack.c.bf16 %v569_v12, %v57_v11  ;;  %114 = vperm.xlu1 %558, %v84_v17   ;;  %v567_v31 = vld [vmem:[%s705_s0 + $0x38] sm:$0xff]   ;;  %v91_v33 = vld [vmem:[%s706_s1 + $0x50] sm:$0xff]  ;;  %v94_v34 = vld [vmem:[%s706_s1 + $0x68] sm:$0xff] }
   0xa   :  { %v92_v32 = vld [vmem:[%s706_s1 + $0x58] sm:$0xff]  ;;  %v93_v35 = vld [vmem:[%s706_s1 + $0x60] sm:$0xff]  ;;  %v95_v37 = vld [vmem:[%s706_s1 + $0x70] sm:$0xff] }
   0xb   :  { %39 = vst [vmem:[#allocation7] sm:$0xf] %v37_v13  ;;  %61 = vst [vmem:[#allocation7 + $0x4] sm:$0xf] %v59_v14  ;;  %104 = vperm.xlu0 %557, %v82_v18   ;;  %v96_v36 = vld [vmem:[%s706_s1 + $0x78] sm:$0xff] }
   0xd   :  { %124 = vperm.xlu1 %558, %v86_v20  }
   0xf   :  { %119 = vperm.xlu0 %557, %v85_v21  }
  0x11   :  { %134 = vperm.xlu1 %558, %v88_v26  }
  0x12   :  { %v559_v19 = vld [vmem:[#allocation7] sm:$0xff]  }
  0x13   :  { %535 = vmatprep.subr.bf16.mxu0 %v559_v19  ;;  %553 = vmatprep.subr.bf16.mxu1 %v559_v19 }
  0x14   :  { %536 = vmatpush3.bf16.msra.mxu0 %v559_v19  ;;  %554 = vmatpush3.bf16.msra.mxu1 %v559_v19 }
  0x15   :  { %129 = vperm.xlu0 %557, %v87_v27   ;;  %144 = vperm.xlu1 %558, %v90_v28  }
  0x17   :  { %538 = vmatmul.mubr.msk.bf16.vlgmr.msra.gmra.mrb[0].mxu0 %vm223_vm0, %v562_v22  ;;  %546 = vmatmul.mubr.msk.bf16.vlgmr.msra.gmra.mrb[0].mxu1 %vm223_vm0, %v563_v23 }
  0x18   :  { %541 = vmatprep.mubr.msk.bf16.mxu0 %vm223_vm0, %v564_v24  ;;  %549 = vmatprep.mubr.msk.bf16.mxu1 %vm223_vm0, %v565_v25 }
  0x19   :  { %139 = vperm.xlu0 %557, %v89_v29   ;;  %154 = vperm.xlu1 %558, %v92_v32  }
  0x1d   :  { %149 = vperm.xlu0 %557, %v91_v33   ;;  %164 = vperm.xlu1 %558, %v94_v34  }
  0x1f   :  { %542 = vmatmul.mubr.msk.bf16.gmra.mrb[4].mxu0 %vm223_vm0, %v566_v30  ;;  %550 = vmatmul.mubr.msk.bf16.gmra.mrb[4].mxu1 %vm223_vm0, %v567_v31 }
  0x21   :  { %159 = vperm.xlu0 %557, %v93_v35   ;;  %174 = vperm.xlu1 %558, %v96_v36  }
  0x25   :  { %169 = vperm.xlu0 %557, %v95_v37  }
  0x84   :  { %v110_v38 = vpop.permute.xlu1 %109 }
  0x86   :  { %v100_v39 = vpop.permute.xlu0 %99 }
  0x88   :  { %v115_v40 = vpop.permute.xlu1 %114 }
  0x8a   :  { %v105_v41 = vpop.permute.xlu0 %104 }
  0x8c   :  { %v125_v42 = vpop.permute.xlu1 %124 }
  0x8e   :  { %v120_v43 = vpop.permute.xlu0 %119 }
  0x90   :  { %v135_v44 = vpop.permute.xlu1 %134 }
  0x94   :  { %v130_v45 = vpop.permute.xlu0 %129  ;;  %v145_v46 = vpop.permute.xlu1 %144 }
  0x98   :  { %v140_v47 = vpop.permute.xlu0 %139  ;;  %v155_v48 = vpop.permute.xlu1 %154 }
  0x9c   :  { %v150_v49 = vpop.permute.xlu0 %149  ;;  %v165_v50 = vpop.permute.xlu1 %164 }
  0xa0   :  { %v160_v51 = vpop.permute.xlu0 %159  ;;  %v175_v8 = vpop.permute.xlu1 %174 }
  0xa4   :  { %v170_v9 = vpop.permute.xlu0 %169 }
  0xea   :  { %v539_v52 = vpop.f32.mrb[0].mxu0  ;;  %v547_v53 = vpop.f32.mrb[0].mxu1 }
  0xeb   :  { %v282_v54 = vpop.f32.mrb[1].mxu0  ;;  %v314_v55 = vpop.f32.mrb[1].mxu1  ;;  %v291_v58 = vadd.f32 %v539_v52, %v110_v38  ;;  %v323_v59 = vadd.f32 %v547_v53, %v150_v49 }
  0xec   :  { %v540_v56 = vpop.f32.mrb[2].mxu0  ;;  %v548_v57 = vpop.f32.mrb[2].mxu1  ;;  %v283_v0 = vadd.f32 %v282_v54, %v100_v39  ;;  %v315_v1 = vadd.f32 %v314_v55, %v140_v47 }
  0xed   :  { %v294_v60 = vadd.f32 %v540_v56, %v115_v40  ;;  %v326_v61 = vadd.f32 %v548_v57, %v155_v48  ;;  %v285_v62 = vpop.f32.mrb[3].mxu0  ;;  %v317_v63 = vpop.f32.mrb[3].mxu1 }
  0xee   :  { %v286_v2 = vadd.f32 %v285_v62, %v105_v41  ;;  %v318_v3 = vadd.f32 %v317_v63, %v145_v46 }
  0xef   :  { %v487_v4 = vpack.c.bf16 %v294_v60, %v291_v58  ;;  %v507_v5 = vpack.c.bf16 %v326_v61, %v323_v59 }
  0xf0   :  { %v482_v6 = vpack.c.bf16 %v286_v2, %v283_v0  ;;  %v502_v7 = vpack.c.bf16 %v318_v3, %v315_v1 }
  0xf1   :  { %519 = vst [vmem:[%s709_s4 + $0x8] sm:$0xff] %v487_v4   ;;  %523 = vst [vmem:[%s709_s4 + $0x28] sm:$0xff] %v507_v5  }
  0xf2   :  { %483 = vst [vmem:[%s709_s4] sm:$0xff] %v482_v6   ;;  %522 = vst [vmem:[%s709_s4 + $0x20] sm:$0xff] %v502_v7   ;;  %v543_v10 = vpop.f32.mrb[4].mxu0  ;;  %v551_v11 = vpop.f32.mrb[4].mxu1 }
  0xf3   :  { %v298_v12 = vpop.f32.mrb[5].mxu0  ;;  %v330_v13 = vpop.f32.mrb[5].mxu1  ;;  %v307_v16 = vadd.f32 %v543_v10, %v130_v45  ;;  %v339_v17 = vadd.f32 %v551_v11, %v170_v9 }
  0xf4   :  { %v544_v14 = vpop.f32.mrb[6].mxu0  ;;  %v552_v15 = vpop.f32.mrb[6].mxu1  ;;  %v299_v22 = vadd.f32 %v298_v12, %v120_v43  ;;  %v331_v23 = vadd.f32 %v330_v13, %v160_v51 }
  0xf5   :  { %v310_v18 = vadd.f32 %v544_v14, %v135_v44  ;;  %v342_v19 = vadd.f32 %v552_v15, %v175_v8  ;;  %v301_v20 = vpop.f32.mrb[7].mxu0  ;;  %v333_v21 = vpop.f32.mrb[7].mxu1 }
  0xf6   :  { %v302_v24 = vadd.f32 %v301_v20, %v125_v42  ;;  %v334_v25 = vadd.f32 %v333_v21, %v165_v50 }
  0xf7   :  { %v497_v26 = vpack.c.bf16 %v310_v18, %v307_v16  ;;  %v517_v27 = vpack.c.bf16 %v342_v19, %v339_v17 }
  0xf8   :  { %v492_v28 = vpack.c.bf16 %v302_v24, %v299_v22  ;;  %v512_v29 = vpack.c.bf16 %v334_v25, %v331_v23 }
  0xf9   :  { %521 = vst [vmem:[%s709_s4 + $0x18] sm:$0xff] %v497_v26   ;;  %525 = vst [vmem:[%s709_s4 + $0x38] sm:$0xff] %v517_v27  }
  0xfa   :  { %520 = vst [vmem:[%s709_s4 + $0x10] sm:$0xff] %v492_v28   ;;  %524 = vst [vmem:[%s709_s4 + $0x30] sm:$0xff] %v512_v29  }

// kernel: forward.9
= control target key start
LH: loop header
LB: loop body
LE: loop exit
PB: predicated region body
PF: predicated region fallthrough
CT: control target
= control target key end

     0   :  { %vm105_vm0 = vcmask 1043456   ;;  %vm92_vm1 = vcmask 64512   ;;  %v291_v1 = vmov 0   ;;  %s367_s1 = inlined_call_operand.vmem [shape: bf16[8,128], index: 1, kind: input, shape index: {}]   ;;  %s368_s0 = inlined_call_operand.vmem [shape: bf16[64,8], index: 0, kind: input, shape index: {}]   ;;  %s369_s2 = inlined_call_operand.vmem [shape: f32[64,1], index: 2, kind: input, shape index: {}]   ;;  %s370_s3 = inlined_call_operand.vmem [shape: bf16[64,128], index: 3, kind: output, shape index: {}]  }
   0x1   :  { %v23_v0 = vld [vmem:[%s367_s1] sm:$0xf]  ;;  %286 = vset.pattern.permute.xlu1 %v291_v1  ;;  %285 = vset.pattern.permute.xlu0 %v291_v1  ;;  %v288_v4 = vld [vmem:[%s368_s0 + $0x10] sm:$0xff]   ;;  %v289_v5 = vld [vmem:[%s368_s0 + $0x8] sm:$0xff]  }
   0x2   :  { %282 = vmatprep.subr.msk.bf16.mxu0 %vm105_vm0, %v23_v0  ;;  %283 = vmatprep.subr.msk.bf16.mxu1 %vm105_vm0, %v23_v0  ;;  %v107_v2 = vsel %vm105_vm0, %v23_v0, 0  ;;  %v287_v3 = vld [vmem:[%s368_s0] sm:$0xff]   ;;  %v290_v6 = vld [vmem:[%s368_s0 + $0x18] sm:$0xff]   ;;  %v26_v7 = vld [vmem:[%s369_s2 + $0x10] sm:$0xff] }
   0x3   :  { %271 = vmatpush3.bf16.msra.mxu0 %v107_v2  ;;  %281 = vmatpush3.bf16.msra.mxu1 %v107_v2  ;;  %v24_v8 = vld [vmem:[%s369_s2] sm:$0xff]  ;;  %v27_v9 = vld [vmem:[%s369_s2 + $0x18] sm:$0xff]  ;;  %v25_v10 = vld [vmem:[%s369_s2 + $0x8] sm:$0xff] }
   0x4   :  { %272 = vmatprep.mubr.msk.bf16.mxu0 %vm92_vm1, %v287_v3  ;;  %276 = vmatprep.mubr.msk.bf16.mxu1 %vm92_vm1, %v288_v4  ;;  %v29_v11 = vld [vmem:[%s369_s2 + $0x28] sm:$0xff]  ;;  %v28_v12 = vld [vmem:[%s369_s2 + $0x20] sm:$0xff]  ;;  %v31_v13 = vld [vmem:[%s369_s2 + $0x38] sm:$0xff] }
   0x5   :  { %44 = vperm.xlu1 %286, %v26_v7   ;;  %34 = vperm.xlu0 %285, %v24_v8   ;;  %v30_v14 = vld [vmem:[%s369_s2 + $0x30] sm:$0xff] }
   0x6   :  { %273 = vmatmul.mubr.msk.bf16.vlgmr.msra.gmra.mrb[0].mxu0 %vm92_vm1, %v289_v5  ;;  %277 = vmatmul.mubr.msk.bf16.vlgmr.msra.gmra.mrb[0].mxu1 %vm92_vm1, %v290_v6 }
   0x9   :  { %49 = vperm.xlu1 %286, %v27_v9   ;;  %39 = vperm.xlu0 %285, %v25_v10  }
   0xd   :  { %59 = vperm.xlu1 %286, %v29_v11   ;;  %54 = vperm.xlu0 %285, %v28_v12  }
  0x11   :  { %69 = vperm.xlu1 %286, %v31_v13   ;;  %64 = vperm.xlu0 %285, %v30_v14  }
  0x84   :  { %v45_v15 = vpop.permute.xlu1 %44  ;;  %v35_v16 = vpop.permute.xlu0 %34 }
  0x88   :  { %v50_v17 = vpop.permute.xlu1 %49  ;;  %v40_v18 = vpop.permute.xlu0 %39 }
  0x8c   :  { %v60_v19 = vpop.permute.xlu1 %59  ;;  %v55_v20 = vpop.permute.xlu0 %54 }
  0x90   :  { %v70_v21 = vpop.permute.xlu1 %69  ;;  %v65_v22 = vpop.permute.xlu0 %64 }
  0xd9   :  { %v274_v23 = vpop.f32.mrb[0].mxu0  ;;  %v278_v24 = vpop.f32.mrb[0].mxu1 }
  0xda   :  { %v143_v25 = vpop.f32.mrb[1].mxu0  ;;  %v159_v26 = vpop.f32.mrb[1].mxu1  ;;  %v152_v28 = vadd.f32 %v274_v23, %v45_v15  ;;  %v168_v32 = vadd.f32 %v278_v24, %v65_v22 }
  0xdb   :  { %v275_v27 = vpop.f32.mrb[2].mxu0  ;;  %v279_v30 = vpop.f32.mrb[2].mxu1  ;;  %v144_v33 = vadd.f32 %v143_v25, %v35_v16  ;;  %v160_v37 = vadd.f32 %v159_v26, %v55_v20 }
  0xdc   :  { %v155_v29 = vadd.f32 %v275_v27, %v50_v17  ;;  %v146_v31 = vpop.f32.mrb[3].mxu0  ;;  %v171_v34 = vadd.f32 %v279_v30, %v70_v21  ;;  %v162_v36 = vpop.f32.mrb[3].mxu1 }
  0xdd   :  { %v147_v35 = vadd.f32 %v146_v31, %v40_v18  ;;  %v163_v39 = vadd.f32 %v162_v36, %v60_v19 }
  0xde   :  { %v250_v38 = vpack.c.bf16 %v155_v29, %v152_v28  ;;  %v260_v40 = vpack.c.bf16 %v171_v34, %v168_v32 }
  0xdf   :  { %v245_v41 = vpack.c.bf16 %v147_v35, %v144_v33  ;;  %v255_v42 = vpack.c.bf16 %v163_v39, %v160_v37 }
  0xe0   :  { %262 = vst [vmem:[%s370_s3 + $0x8] sm:$0xff] %v250_v38   ;;  %264 = vst [vmem:[%s370_s3 + $0x18] sm:$0xff] %v260_v40  }
  0xe1   :  { %246 = vst [vmem:[%s370_s3] sm:$0xff] %v245_v41   ;;  %263 = vst [vmem:[%s370_s3 + $0x10] sm:$0xff] %v255_v42  }

</bundles_post_ra>
